<compile_context>
chip_gen: v5e
topology: v5e:2x2
jax: 0.10.0
libtpu: 0.0.40
codegen_flags: <defaults>
</compile_context>

<pallas_src>
import jax
import jax.numpy as jnp
from jax import lax
from jax.experimental import pallas as pl
from jax.experimental.pallas import tpu as pltpu


def _round_up(x, m):
    return ((x + m - 1) // m) * m


def _make_kernel(kernel_size, dilation, halo, has_halo, time_axis):
    """Builds the Pallas body.

    Refs (in order): x_cur[, x_halo], w_fused, bias, out
      x_cur : (C_in, tile_t)      current time tile
      x_halo: (C_in, halo_blk)    block ending where the current tile starts (causal halo)
      w     : (tile_co, C_in*K)   taps fused along the contraction dim (k-major, ci-minor)
      bias  : (tile_co, 1)
      out   : (tile_co, tile_t)
    """

    def body(*refs):
        if has_halo:
            x_ref, halo_ref, w_ref, b_ref, o_ref = refs
        else:
            x_ref, w_ref, b_ref, o_ref = refs
            halo_ref = None

        c_in, tile_t = x_ref.shape
        x_cur = x_ref[...]

        if halo > 0:
            if has_halo:
                hb = halo_ref.shape[-1]
                halo_cols = halo_ref[:, hb - halo:]                  # (C_in, halo)
                # First time tile: the causal halo is zeros, not data from tile -1.
                keep = (pl.program_id(time_axis) > 0).astype(x_cur.dtype)
                halo_cols = halo_cols * keep
            else:
                halo_cols = jnp.zeros((c_in, halo), dtype=x_cur.dtype)
            x_win = jnp.concatenate([halo_cols, x_cur], axis=-1)     # (C_in, halo+tile_t)
        else:
            x_win = x_cur

        # Fuse the K dilated taps into one MXU contraction of size C_in*K.
        if kernel_size == 1:
            xk = x_win                                               # (C_in, tile_t)
        else:
            parts = [x_win[:, k * dilation: k * dilation + tile_t]
                     for k in range(kernel_size)]
            xk = jnp.concatenate(parts, axis=0)                      # (C_in*K, tile_t)

        acc = jnp.dot(w_ref[...], xk, preferred_element_type=jnp.float32)
        o_ref[...] = (acc + b_ref[...]).astype(o_ref.dtype)

    return body


def causal_conv1d(x, weight, bias, *, kernel, dilation, tile_t=None, tile_co=None):
    """Causal dilated Conv1d.

    x: (B, C_in, T) f32; weight: (C_out, C_in, K); bias: (C_out,)  ->  (B, C_out, T).
    Matches nn.Conv1d(..., dilation=d, padding=d*(K-1)) followed by trimming the
    trailing d*(K-1) samples.
    """
    b, c_in, t = x.shape
    c_out, c_in_w, k_w = weight.shape
    assert c_in_w == c_in and k_w == kernel
    halo = dilation * (kernel - 1)
    itemsize = jnp.dtype(x.dtype).itemsize

    # ---- time tiling (lane axis): lane-dense tiles; halo handled in-kernel ----
    if tile_t is None:
        base = 512
        if t <= base:
            tile_t = _round_up(t, 128)            # single lane-dense tile
        else:
            hb = _round_up(max(halo, 1), 128)
            tile_t = _round_up(max(base, hb), hb)  # multiple of 128 and of halo block
    t_pad = _round_up(t, tile_t)
    n_t = t_pad // tile_t
    if n_t > 1:
        assert tile_t % 128 == 0, "time tile must be a multiple of 128"
        assert halo <= tile_t, "time tile must cover the causal halo d*(K-1)"

    has_halo = (n_t > 1) and (halo > 0)
    if has_halo:
        hb = _round_up(halo, 128)
        halo_blk = hb if tile_t % hb == 0 else tile_t
        halo_ratio = tile_t // halo_blk
    else:
        halo_blk = 0
        halo_ratio = 1

    # ---- output-channel tiling ----
    if tile_co is None:
        tile_co = c_out if c_out <= 256 else 128
    co_pad = _round_up(c_out, tile_co)
    n_co = co_pad // tile_co
    if n_co > 1:
        assert tile_co % 8 == 0, "C_out tile must be a multiple of 8"

    # ---- operand prep (cheap glue; no full causal left-pad copy of x in HBM) ----
    x_in = x if t_pad == t else jnp.pad(x, ((0, 0), (0, 0), (0, t_pad - t)))
    # weight[co, ci, k] -> column index k*C_in + ci (matches in-kernel tap stacking).
    w_fused = jnp.transpose(weight, (0, 2, 1)).reshape(c_out, kernel * c_in)
    b2d = bias.reshape(c_out, 1)
    if co_pad != c_out:
        w_fused = jnp.pad(w_fused, ((0, co_pad - c_out), (0, 0)))
        b2d = jnp.pad(b2d, ((0, co_pad - c_out), (0, 0)))

    # ---- block specs ----
    in_specs = [pl.BlockSpec((pl.Squeezed(), c_in, tile_t),
                             lambda bi, co, ti: (bi, 0, ti))]
    inputs = [x_in]
    if has_halo:
        in_specs.append(pl.BlockSpec(
            (pl.Squeezed(), c_in, halo_blk),
            lambda bi, co, ti: (bi, 0, jnp.maximum(ti * halo_ratio - 1, 0))))
        inputs.append(x_in)
    in_specs += [
        pl.BlockSpec((tile_co, kernel * c_in), lambda bi, co, ti: (co, 0)),  # resident over time
        pl.BlockSpec((tile_co, 1), lambda bi, co, ti: (co, 0)),
    ]
    inputs += [w_fused, b2d]
    out_spec = pl.BlockSpec((pl.Squeezed(), tile_co, tile_t),
                            lambda bi, co, ti: (bi, co, ti))

    # ---- VMEM budget: double-buffered streaming blocks + resident weights, with headroom ----
    blk_bytes = itemsize * (
        2 * (c_in * tile_t + c_in * halo_blk + tile_co * tile_t)
        + 2 * (tile_co * kernel * c_in + tile_co))
    vmem_limit = int(min(64 * 2 ** 20, max(32 * 2 ** 20, 2 * blk_bytes)))

    kern = _make_kernel(kernel, dilation, halo, has_halo, time_axis=2)

    out = pl.pallas_call(
        kern,
        out_shape=jax.ShapeDtypeStruct((b, co_pad, t_pad), x.dtype),
        grid=(b, n_co, n_t),
        in_specs=in_specs,
        out_specs=out_spec,
        compiler_params=pltpu.CompilerParams(
            dimension_semantics=("parallel", "parallel", "parallel"),
            vmem_limit_bytes=vmem_limit),
    )(*inputs)

    return out[:, :c_out, :t]


def _reference(x, weight, bias, *, kernel, dilation):
    # Pure-JAX reference mirroring the PyTorch module (pad both sides, trim tail).
    padding = dilation * (kernel - 1)
    out = lax.conv_general_dilated(
        x, weight,
        window_strides=(1,),
        padding=[(padding, padding)],
        rhs_dilation=(dilation,),
        dimension_numbers=("NCH", "OIH", "NCH"),
    )
    out = out + bias.reshape(1, -1, 1)
    return out[..., : x.shape[-1]]  # trim trailing `padding` samples (safe when padding == 0)


if __name__ == "__main__":
    key = jax.random.PRNGKey(0)

    def xavier_conv1d(k, c_out, c_in, ksz):
        kw, kb = jax.random.split(k)
        fan_in, fan_out = c_in * ksz, c_out * ksz
        limit = (6.0 / (fan_in + fan_out)) ** 0.5
        w = jax.random.uniform(kw, (c_out, c_in, ksz), minval=-limit, maxval=limit,
                               dtype=jnp.float32)
        bb = jax.random.uniform(kb, (c_out,), minval=-0.1, maxval=0.1, dtype=jnp.float32)
        return w, bb

    cases = [
        # (B, C_in, C_out, T, K, dilation, tile_t, tile_co)
        (2, 4, 6, 16, 3, 2, None, None),    # original demo shape (single time tile)
        (1, 8, 16, 384, 3, 16, 128, 8),     # multi time tile + in-kernel halo + C_out tiling
        (2, 4, 4, 16, 1, 1, None, None),    # kernel=1 edge case (no causal padding)
    ]

    for i, (B, C_IN, C_OUT, T, K, D, TT, TC) in enumerate(cases):
        key, kx, kw = jax.random.split(key, 3)
        x = jax.random.normal(kx, (B, C_IN, T), dtype=jnp.float32)
        w, bb = xavier_conv1d(kw, C_OUT, C_IN, K)

        out = causal_conv1d(x, w, bb, kernel=K, dilation=D, tile_t=TT, tile_co=TC)
        out = jax.block_until_ready(out)

        ref = _reference(x, w, bb, kernel=K, dilation=D)
        assert out.shape == (B, C_OUT, T), (i, out.shape)
        assert jnp.allclose(out, ref, atol=1e-5, rtol=1e-5), f"case {i}: mismatch vs reference"

    print("KERNEL_OK")
</pallas_src>

<mosaic_0001>
module attributes {stable_mosaic.version = 11 : i64} {
  func.func @body(%arg0: i32, %arg1: i32, %arg2: i32, %arg3: memref<1x4x128xf32, #tpu.memory_space<vmem>>, %arg4: memref<6x12xf32, #tpu.memory_space<vmem>>, %arg5: memref<6x1xf32, #tpu.memory_space<vmem>>, %arg6: memref<1x6x128xf32, #tpu.memory_space<vmem>>) attributes {dimension_semantics = [#tpu.dimension_semantics<parallel>, #tpu.dimension_semantics<parallel>, #tpu.dimension_semantics<parallel>], iteration_bounds = array<i64: 2, 1, 1>, scalar_prefetch = 0 : i64, scratch_operands = 0 : i64, tpu.core_type = #tpu.core_type<tc>, window_params = [{transform_indices = @transform_0, window_bounds = array<i64: 1, 4, 128>}, {transform_indices = @transform_1, window_bounds = array<i64: 6, 12>}, {transform_indices = @transform_2, window_bounds = array<i64: 6, 1>}, {transform_indices = @transform_3, window_bounds = array<i64: 1, 6, 128>}]} {
    %c0 = arith.constant 0 : index
    %c0_0 = arith.constant 0 : index
    %c0_1 = arith.constant 0 : index
    %0 = vector.load %arg3[%c0, %c0_0, %c0_1] : memref<1x4x128xf32, #tpu.memory_space<vmem>>, vector<1x4x128xf32>
    %1 = vector.shape_cast %0 : vector<1x4x128xf32> to vector<4x128xf32>
    %cst = arith.constant 0.000000e+00 : f32
    %2 = vector.broadcast %cst : f32 to vector<4x4xf32>
    %3 = tpu.concatenate %2, %1 in 1 : vector<4x4xf32>, vector<4x128xf32> -> vector<4x132xf32>
    %4 = vector.extract_strided_slice %3 {offsets = [0, 0], sizes = [4, 128], strides = [1, 1]} : vector<4x132xf32> to vector<4x128xf32>
    %5 = vector.extract_strided_slice %3 {offsets = [0, 2], sizes = [4, 128], strides = [1, 1]} : vector<4x132xf32> to vector<4x128xf32>
    %6 = vector.extract_strided_slice %3 {offsets = [0, 4], sizes = [4, 128], strides = [1, 1]} : vector<4x132xf32> to vector<4x128xf32>
    %7 = tpu.concatenate %4, %5, %6 in 0 : vector<4x128xf32>, vector<4x128xf32>, vector<4x128xf32> -> vector<12x128xf32>
    %c0_2 = arith.constant 0 : index
    %c0_3 = arith.constant 0 : index
    %8 = vector.load %arg4[%c0_2, %c0_3] : memref<6x12xf32, #tpu.memory_space<vmem>>, vector<6x12xf32>
    %cst_4 = arith.constant dense<0.000000e+00> : vector<6x128xf32>
    %9 = tpu.matmul %8, %7, %cst_4 {dimension_numbers = #tpu.dot_dimension_numbers<[1], [0], [0], [1], [0, 0, 1, 1], [], []>} : vector<6x12xf32>, vector<12x128xf32>, vector<6x128xf32> -> vector<6x128xf32>
    %c0_5 = arith.constant 0 : index
    %c0_6 = arith.constant 0 : index
    %10 = vector.load %arg5[%c0_5, %c0_6] : memref<6x1xf32, #tpu.memory_space<vmem>>, vector<6x1xf32>
    %11 = vector.broadcast %10 : vector<6x1xf32> to vector<6x128xf32>
    %12 = arith.addf %9, %11 : vector<6x128xf32>
    %c0_7 = arith.constant 0 : index
    %c0_8 = arith.constant 0 : index
    %c0_9 = arith.constant 0 : index
    %13 = vector.load %arg6[%c0_7, %c0_8, %c0_9] : memref<1x6x128xf32, #tpu.memory_space<vmem>>, vector<1x6x128xf32>
    %14 = vector.shape_cast %13 : vector<1x6x128xf32> to vector<6x128xf32>
    %15 = vector.shape_cast %12 : vector<6x128xf32> to vector<1x6x128xf32>
    tpu.vector_store %arg6[%c0_7, %c0_8, %c0_9], %15 {strides = array<i32>} : memref<1x6x128xf32, #tpu.memory_space<vmem>>, vector<1x6x128xf32>,
    return
  }
  func.func @transform_0(%arg0: i32, %arg1: i32, %arg2: i32) -> (i32, i32, i32) {
    %c0_i32 = arith.constant 0 : i32
    %c0_i32_0 = arith.constant 0 : i32
    return %arg0, %c0_i32, %arg2 : i32, i32, i32
  }
  func.func @transform_1(%arg0: i32, %arg1: i32, %arg2: i32) -> (i32, i32) {
    %c0_i32 = arith.constant 0 : i32
    %c0_i32_0 = arith.constant 0 : i32
    return %arg1, %c0_i32 : i32, i32
  }
  func.func @transform_2(%arg0: i32, %arg1: i32, %arg2: i32) -> (i32, i32) {
    %c0_i32 = arith.constant 0 : i32
    %c0_i32_0 = arith.constant 0 : i32
    return %arg1, %c0_i32 : i32, i32
  }
  func.func @transform_3(%arg0: i32, %arg1: i32, %arg2: i32) -> (i32, i32, i32) {
    %c0_i32 = arith.constant 0 : i32
    return %arg0, %arg1, %arg2 : i32, i32, i32
  }
}

</mosaic_0001>

<bundles_post_ra>
// kernel: tpu_custom_call.1
= control target key start
LH: loop header
LB: loop body
LE: loop exit
PB: predicated region body
PF: predicated region fallthrough
CT: control target
= control target key end

     0   :  { %8 = vsyncpa [#allocation3], 0  ;;  %s570_s12 = smov 0   ;;  %s572_s13 = smov 0   ;;  %s614_s0 = inlined_call_operand.vmem [shape: f32[2,4,128], index: 0, kind: input, shape index: {}]   ;;  %s615_s1 = inlined_call_operand.hbm [shape: f32[6,12], index: 1, kind: input, shape index: {}]   ;;  %s616_s2 = inlined_call_operand.vmem [shape: f32[6,1], index: 2, kind: input, shape index: {}]   ;;  %s617_s3 = inlined_call_operand.vmem [shape: f32[2,6,128], index: 3, kind: output, shape index: {}]  }
   0x1   :  { %s574_s14 = smov 0  }
   0x2 LB: > { %s427_s15 = sadd.s32 4294967295, %s543_s14   ;;  %s33_s16 = sadd.s32 1, %s539_s13  ;;  %s543_s14 = sphi %s574_s14, %s14_s14   ;;  %s539_s13 = sphi %s572_s13, %s619_s13   ;;  %s535_s12 = sphi %s570_s12, %s618_s12  }
   0x3   : > { %p35_p0 = scmp.ge.s32.totalorder %s33_s16, 2  ;;  %p429_p1 = scmp.ge.s32.totalorder %s543_s14, 1 }
   0x4   : > { %p148_p2 = scmp.lt.s32.totalorder %s543_s14, 3  ;;  %p449_p4 = scmp.eq.s32.totalorder %s427_s15, 0 }
   0x5   : > { %s621_s16 = smov (%p35_p0, %s33_s16), 0  ;;  %s162_s19 = sshll.u32 %s615_s1, 4  ;;  %s163_s19 = int_to_ptr.hbm [resolvable:$true] %s162_s19 }
   0x6   : > { %p149_p3 = pnand %p429_p1, %p148_p2  ;;  %s545_s20 = smov [#allocation2]  }
   0x7   : > { %s164_s21 = sshll.u32 %s545_s20, 4  ;;  %s165_s21 = int_to_ptr.vmem [resolvable:$true] %s164_s21 }
   0x8   : > { %p445_p5 = pneg %p149_p3  ;;  %194 = sbr.rel (%p149_p3) target bundleno = 392 (0x188), region = 32 }
   0xa   : > { %p446_p6 = pnand %p449_p4, %p445_p5 }
   0xc   : > { %448 = dma.hbm_to_vmem [thread:$0]  (!%p446_p6), %s163_s19, 128, %s165_s21, [#allocation3]  }
   0xd   : > { %530 = dma.done.wait (%p449_p4), [#allocation3], 128  }
   0xe   : > { %532 = vsyncadd (%p449_p4), [#allocation3], 4294967168  ;;  %p230_p7 = scmp.lt.s32.totalorder %s535_s12, 1  ;;  %s546_s26 = smov 4   ;;  %vm256_vm0 = vcmask 31744   ;;  %v549_v7 = vmov 0  }
   0xf   : > { %s547_s27 = smov 124   ;;  %s548_s28 = smov 126   ;;  %v277_v6 = vld [vmem:[%s616_s2] sm:$0x3f]  ;;  %485 = vset.pattern.permute.xlu2 %v549_v7  ;;  %486 = vset.pattern.permute.xlu0 %v549_v7  ;;  %vm272_vm1 = vcmask 1014784   ;;  %vm274_vm2 = vcmask 1043456  }
  0x10   : > { %s623_s12 = smov (!%p230_p7, %s535_s12), 1  ;;  %280 = vperm.xlu2 %485, %v277_v6   ;;  %vm265_vm3 = vcmask 1031168   ;;  %v276_v15 = vld [vmem:[#allocation2] sm:$0x3f]  ;;  %vm283_vm4 = vcmask 97280  }
  0x11   : > { %s435_s22 = sshll.u32 %s623_s12, 2  ;;  %s436_s4 = sshll.u32 %s623_s12, 3 }
  0x12   : > { %s236_s25 = scalar_lea.vmem %s614_s0, %s435_s22  ;;  %s250_s7 = scalar_lea.vmem %s617_s3, %s436_s4 }
  0x13   : > { %v251_v0 = vld [vmem:[%s236_s25] sm:$0xf] }
  0x14   : > { %253 = vrot.lane.b32.xlu0 %v251_v0, %s546_s26 }
  0x6a   : > { %v281_v17 = vpop.permute.xlu2 %280 }
  0x86   : > { %v254_v1 = vpop.permute.xlu0 %253 }
  0x87   : > { %270 = vrot.lane.b32.xlu1 %v254_v1, %s547_s27  ;;  %v257_v2 = vsel %vm256_vm0, 0.0, %v254_v1  ;;  %v260_v3 = vrot.slane %v254_v1, 4 }
  0x88   : > { %268 = vrot.lane.b32.xlu0 %v257_v2, %s547_s27  ;;  %v259_v4 = vrot.slane %v257_v2, 4 }
  0x8a   : > { %v480_v5 = vpack.i.bf16 %v260_v3, %v259_v4 }
  0x8f   : > { %481 = vrot.lane.b32.xlu1 %v480_v5, %s548_s28 }
  0xf9   : > { %v271_v8 = vpop.permute.xlu1 %270 }
  0xfa   : > { %v269_v9 = vpop.permute.xlu0 %268 }
  0xfb   : > { %v273_v10 = vsel %vm272_vm1, %v269_v9, %v271_v8 }
  0xfc   : > { %437 = vmatpush.msk.msra.mxu0 %vm274_vm2, %v273_v10 }
 0x101   : > { %v482_v11 = vpop.permute.xlu1 %481 }
 0x102   : > { %v484_v12 = vunpack.i.h.bf16 %v482_v11  ;;  %v483_v13 = vunpack.i.l.bf16 %v482_v11 }
 0x104   : > { %v266_v14 = vsel %vm265_vm3, %v483_v13, %v484_v12 }
 0x105   : > { %v275_v16 = vsel %vm274_vm2, %v257_v2, %v266_v14 }
 0x106   : > { %304 = vmatpush.msra.mxu0 %v275_v16 }
 0x107   : > { %438 = vmatmul.msk.f32.vlgmr.msra.gmra.mxu0 %vm283_vm4, %v276_v15 }
 0x184   : > { %v306_v18 = vpop.f32.mrf.mxu0 }
 0x185   : > { %v307_v19 = vadd.f32 %v306_v18, %v281_v17 }
 0x187   : > { %309 = vst [vmem:[%s250_s7] sm:$0x3f] %v307_v19 }
 0x188 PF: > { %s14_s14 = sadd.s32 1, %s543_s14   ;;  %s618_s12 = smov %s539_s13 }
 0x189   : > { %p11_p8 = scmp.ge.s32.totalorder %s14_s14, 4   ;;  %s619_s13 = smov %s621_s16 }
 0x18b   :  { %13 = sbr.rel (!%p11_p8) target bundleno = 2 (0x2), region = 71 }
 0x190   :  { %341 = vsyncpa [#allocation3], 1 }
 0x191   :  { %343 = vsyncpa [#allocation3 + $0x1], 1 }

</bundles_post_ra>
